<compile_context>
chip_gen: v7x
topology: tpu7x:2x2x1
jax: 0.10.0
libtpu: 0.0.40
codegen_flags: <defaults>
</compile_context>

<pallas_src>
import functools

import jax
import jax.numpy as jnp
from jax.experimental import pallas as pl
from jax.experimental.pallas import tpu as pltpu


def _round_up(x, m):
    return ((x + m - 1) // m) * m


def _dice_stats_kernel(s_ref, t_ref, out_ref, *, num_classes, ignore_index,
                       apply_softmax, tile_p, tiles_per_split, n_valid,
                       approx_reciprocal):
    sp = pl.program_id(0)      # parallel pixel-split index
    b = pl.program_id(1)       # batch index (reduction)
    p = pl.program_id(2)       # pixel tile within split (reduction)

    s = s_ref[...].astype(jnp.float32)     # (C, tile_p)  classes x pixels
    t = t_ref[...].astype(jnp.int32)       # (1, tile_p)

    if apply_softmax:
        m = jnp.max(s, axis=0, keepdims=True)           # (1, tile_p)
        e = jnp.exp(s - m)
        denom = jnp.sum(e, axis=0, keepdims=True)       # (1, tile_p)
        if approx_reciprocal:
            s = e * pl.reciprocal(denom, approx=True)
        else:
            s = e / denom

    if n_valid is not None:
        # Only the ragged tail tile has lanes >= n_valid; zero their score
        # contribution and make the one-hot all-zero via an out-of-range class.
        start = (sp * tiles_per_split + p) * tile_p
        lane = jax.lax.broadcasted_iota(jnp.int32, (1, tile_p), 1) + start
        valid = lane < n_valid
        s = jnp.where(valid, s, 0.0)
        t = jnp.where(valid, t, -1)

    # PyTorch: targets = targets * (targets != ignore_index) -> ignored pixels
    # become class 0 (and still carry softmax mass in x_sum), as in reference.
    t = jnp.where(t == ignore_index, 0, t)

    cls = jax.lax.broadcasted_iota(jnp.int32, (num_classes, tile_p), 0)
    onehot = (cls == t).astype(jnp.float32)             # (C, tile_p)

    inter = jnp.sum(s * onehot, axis=1, keepdims=True)  # (C, 1)
    x_sum = jnp.sum(s * s, axis=1, keepdims=True)       # (C, 1)
    y_sum = jnp.sum(onehot, axis=1, keepdims=True)      # (C, 1), onehot^2==onehot

    @pl.when(jnp.logical_and(b == 0, p == 0))
    def _():
        out_ref[...] = jnp.zeros_like(out_ref)

    out_ref[:, 0:1] += inter
    out_ref[:, 1:2] += x_sum
    out_ref[:, 2:3] += y_sum


def dice_loss(inputs, targets, *, num_classes, ignore_index=255, softmax=True,
              weight=None, tile_p=None, num_splits=2, approx_reciprocal=False):
    """JAX/Pallas equivalent of DiceLoss.forward.

    inputs : (B, C, H, W) logits (NCHW, native dtype - f32 or bf16)
    targets: (B, H, W) integer labels
    Returns (mean_loss, class_wise_dice) with class_wise_dice a (C,) array of
    per-class dice coefficients (mirrors the PyTorch list semantics).
    """
    B, C, H, W = inputs.shape
    assert C == num_classes
    assert targets.shape == (B, H, W)
    P = H * W

    # Native-layout views: pixels on lanes, classes on sublanes. Free reshapes.
    s = inputs.reshape(B, C, P)             # keep native dtype
    t = targets.reshape(B, 1, P)            # keep native integer dtype

    # Tile sizing: ~1 MiB of f32 per logits block, lane axis multiple of 128.
    if tile_p is None:
        tile_p = (1 << 20) // (4 * C)
    tile_p = min(tile_p, _round_up(P, 128))
    tile_p = max(128, (tile_p // 128) * 128)

    n_tiles = (P + tile_p - 1) // tile_p
    # v7x megacore: split pixel tiles into independent parallel chunks (must
    # divide evenly so every chunk sees only in-bounds tile starts).
    n_split = max(1, min(int(num_splits), n_tiles))
    while n_tiles % n_split != 0:
        n_split -= 1
    tiles_per_split = n_tiles // n_split

    has_tail = (n_tiles * tile_p != P)

    kernel = functools.partial(
        _dice_stats_kernel,
        num_classes=C,
        ignore_index=ignore_index,
        apply_softmax=softmax,
        tile_p=tile_p,
        tiles_per_split=tiles_per_split,
        n_valid=P if has_tail else None,
        approx_reciprocal=approx_reciprocal,
    )

    partial_stats = pl.pallas_call(
        kernel,
        out_shape=jax.ShapeDtypeStruct((n_split, C, 3), jnp.float32),
        grid=(n_split, B, tiles_per_split),
        in_specs=[
            pl.BlockSpec((None, C, tile_p),
                         lambda sp, b, p: (b, 0, sp * tiles_per_split + p)),
            pl.BlockSpec((None, 1, tile_p),
                         lambda sp, b, p: (b, 0, sp * tiles_per_split + p)),
        ],
        out_specs=pl.BlockSpec((None, C, 3), lambda sp, b, p: (sp, 0, 0)),
        compiler_params=pltpu.CompilerParams(
            dimension_semantics=("parallel", "arbitrary", "arbitrary"),
            vmem_limit_bytes=32 * 1024 * 1024),
    )(s, t)

    stats = jnp.sum(partial_stats, axis=0)              # (C, 3)
    inter, x_sum, y_sum = stats[:, 0], stats[:, 1], stats[:, 2]

    smooth = 1e-5
    dice = (2.0 * inter + smooth) / (x_sum + y_sum + smooth)   # (C,)
    class_loss = 1.0 - dice

    if weight is None:
        w = jnp.ones((C,), jnp.float32)
    else:
        w = jnp.asarray(weight, jnp.float32)

    loss = jnp.sum(class_loss * w) / num_classes
    class_wise_dice = dice   # == 1 - (1 - dice) per class, as in the PyTorch code
    return loss, class_wise_dice


def _dice_loss_ref(inputs, targets, *, num_classes, ignore_index=255,
                   softmax=True, weight=None):
    """Pure-JAX reference mirroring the PyTorch module exactly."""
    x = inputs.astype(jnp.float32)
    if softmax:
        x = jax.nn.softmax(x, axis=1)
    t = jnp.where(targets == ignore_index, 0, targets)
    onehot = jax.nn.one_hot(t, num_classes, axis=1, dtype=jnp.float32)  # (B,C,H,W)
    smooth = 1e-5
    inter = jnp.sum(x * onehot, axis=(0, 2, 3))
    x_sum = jnp.sum(x * x, axis=(0, 2, 3))
    y_sum = jnp.sum(onehot * onehot, axis=(0, 2, 3))
    dice = (2.0 * inter + smooth) / (x_sum + y_sum + smooth)
    if weight is None:
        weight = jnp.ones((num_classes,), jnp.float32)
    loss = jnp.sum((1.0 - dice) * weight) / num_classes
    return loss, dice


if __name__ == "__main__":
    ignore_index = 255
    key = jax.random.PRNGKey(0)

    # --- test 1: f32 logits, exact tiling (B=2, C=4, 16x16) ---
    B, C, H, W = 2, 4, 16, 16
    k1, k2, k3, k4 = jax.random.split(key, 4)
    inputs = jax.random.normal(k1, (B, C, H, W), dtype=jnp.float32)
    targets = jax.random.randint(k2, (B, H, W), 0, C, dtype=jnp.int32)
    ignore_mask = jax.random.bernoulli(k3, 0.1, (B, H, W))
    targets = jnp.where(ignore_mask, ignore_index, targets)

    loss, dice = dice_loss(inputs, targets, num_classes=C,
                           ignore_index=ignore_index, softmax=True)
    loss = jax.block_until_ready(loss)
    dice = jax.block_until_ready(dice)
    loss_ref, dice_ref = _dice_loss_ref(inputs, targets, num_classes=C,
                                        ignore_index=ignore_index, softmax=True)
    assert jnp.allclose(loss, loss_ref, atol=1e-5, rtol=1e-5), (loss, loss_ref)
    assert jnp.allclose(dice, dice_ref, atol=1e-5, rtol=1e-5)

    # --- test 2: bf16 logits, ragged pixel count (tail masking) and a 2-way
    #     parallel pixel split (exercises the v7x megacore path) ---
    B2, C2, H2, W2 = 2, 4, 33, 31          # P = 1023 -> 8 tiles of 128 + tail
    k5, k6, k7 = jax.random.split(k4, 3)
    inputs2 = jax.random.normal(k5, (B2, C2, H2, W2), dtype=jnp.bfloat16)
    targets2 = jax.random.randint(k6, (B2, H2, W2), 0, C2, dtype=jnp.int32)
    ignore_mask2 = jax.random.bernoulli(k7, 0.1, (B2, H2, W2))
    targets2 = jnp.where(ignore_mask2, ignore_index, targets2)

    loss2, dice2 = dice_loss(inputs2, targets2, num_classes=C2,
                             ignore_index=ignore_index, softmax=True,
                             tile_p=128, num_splits=2)
    loss2 = jax.block_until_ready(loss2)
    dice2 = jax.block_until_ready(dice2)
    loss2_ref, dice2_ref = _dice_loss_ref(inputs2, targets2, num_classes=C2,
                                          ignore_index=ignore_index, softmax=True)
    assert jnp.allclose(loss2, loss2_ref, atol=1e-4, rtol=1e-4), (loss2, loss2_ref)
    assert jnp.allclose(dice2, dice2_ref, atol=1e-4, rtol=1e-4)

    print("KERNEL_OK")
</pallas_src>

<mosaic_0001>
module attributes {stable_mosaic.version = 11 : i64} {
  func.func @_dice_stats_kernel(%arg0: i32, %arg1: i32, %arg2: i32, %arg3: memref<1x4x256xf32, #tpu.memory_space<vmem>>, %arg4: memref<1x1x256xi32, #tpu.memory_space<vmem>>, %arg5: memref<1x4x3xf32, #tpu.memory_space<vmem>>) attributes {dimension_semantics = [#tpu.dimension_semantics<parallel>, #tpu.dimension_semantics<arbitrary>, #tpu.dimension_semantics<arbitrary>], iteration_bounds = array<i64: 1, 2, 1>, scalar_prefetch = 0 : i64, scratch_operands = 0 : i64, tpu.core_type = #tpu.core_type<tc>, window_params = [{transform_indices = @transform_0, window_bounds = array<i64: 1, 4, 256>}, {transform_indices = @transform_1, window_bounds = array<i64: 1, 1, 256>}, {transform_indices = @transform_2, window_bounds = array<i64: 1, 4, 3>}]} {
    %c0 = arith.constant 0 : index
    %c0_0 = arith.constant 0 : index
    %c0_1 = arith.constant 0 : index
    %0 = vector.load %arg3[%c0, %c0_0, %c0_1] : memref<1x4x256xf32, #tpu.memory_space<vmem>>, vector<1x4x256xf32>
    %1 = vector.shape_cast %0 : vector<1x4x256xf32> to vector<4x256xf32>
    %c0_2 = arith.constant 0 : index
    %c0_3 = arith.constant 0 : index
    %c0_4 = arith.constant 0 : index
    %2 = vector.load %arg4[%c0_2, %c0_3, %c0_4] : memref<1x1x256xi32, #tpu.memory_space<vmem>>, vector<1x1x256xi32>
    %3 = vector.shape_cast %2 : vector<1x1x256xi32> to vector<1x256xi32>
    %cst = arith.constant dense<0xFF800000> : vector<256xf32>
    %4 = vector.multi_reduction <maximumf>, %1, %cst [0] : vector<4x256xf32> to vector<256xf32>
    %5 = vector.shape_cast %4 : vector<256xf32> to vector<1x256xf32>
    %6 = vector.broadcast %5 : vector<1x256xf32> to vector<4x256xf32>
    %7 = arith.subf %1, %6 : vector<4x256xf32>
    %8 = math.exp %7 : vector<4x256xf32>
    %cst_5 = arith.constant dense<0.000000e+00> : vector<256xf32>
    %9 = vector.multi_reduction <add>, %8, %cst_5 [0] : vector<4x256xf32> to vector<256xf32>
    %10 = vector.shape_cast %9 : vector<256xf32> to vector<1x256xf32>
    %11 = vector.broadcast %10 : vector<1x256xf32> to vector<4x256xf32>
    %12 = arith.divf %8, %11 : vector<4x256xf32>
    %c255_i32 = arith.constant 255 : i32
    %13 = vector.broadcast %c255_i32 : i32 to vector<1x256xi32>
    %14 = arith.cmpi eq, %3, %13 : vector<1x256xi32>
    %c0_i32 = arith.constant 0 : i32
    %15 = vector.broadcast %c0_i32 : i32 to vector<1x256xi32>
    %16 = arith.select %14, %15, %3 : vector<1x256xi1>, vector<1x256xi32>
    %17 = tpu.iota {dimensions = array<i32: 0>} : vector<4x256xi32>
    %18 = vector.broadcast %16 : vector<1x256xi32> to vector<4x256xi32>
    %19 = arith.cmpi eq, %17, %18 : vector<4x256xi32>
    %20 = arith.extui %19 : vector<4x256xi1> to vector<4x256xi32>
    %21 = arith.sitofp %20 : vector<4x256xi32> to vector<4x256xf32>
    %22 = arith.mulf %12, %21 : vector<4x256xf32>
    %cst_6 = arith.constant dense<0.000000e+00> : vector<4xf32>
    %23 = vector.multi_reduction <add>, %22, %cst_6 [1] : vector<4x256xf32> to vector<4xf32>
    %24 = vector.shape_cast %23 : vector<4xf32> to vector<4x1xf32>
    %25 = arith.mulf %12, %12 : vector<4x256xf32>
    %cst_7 = arith.constant dense<0.000000e+00> : vector<4xf32>
    %26 = vector.multi_reduction <add>, %25, %cst_7 [1] : vector<4x256xf32> to vector<4xf32>
    %27 = vector.shape_cast %26 : vector<4xf32> to vector<4x1xf32>
    %cst_8 = arith.constant dense<0.000000e+00> : vector<4xf32>
    %28 = vector.multi_reduction <add>, %21, %cst_8 [1] : vector<4x256xf32> to vector<4xf32>
    %29 = vector.shape_cast %28 : vector<4xf32> to vector<4x1xf32>
    %c0_i32_9 = arith.constant 0 : i32
    %30 = arith.cmpi eq, %arg1, %c0_i32_9 : i32
    %c0_i32_10 = arith.constant 0 : i32
    %31 = arith.cmpi eq, %arg2, %c0_i32_10 : i32
    %32 = arith.andi %30, %31 : i1
    %33 = arith.extui %32 : i1 to i32
    %c0_i32_11 = arith.constant 0 : i32
    %34 = arith.cmpi ne, %33, %c0_i32_11 : i32
    scf.if %34 {
      %cst_28 = arith.constant 0.000000e+00 : f32
      %53 = vector.broadcast %cst_28 : f32 to vector<4x3xf32>
      %c0_29 = arith.constant 0 : index
      %c0_30 = arith.constant 0 : index
      %c0_31 = arith.constant 0 : index
      %54 = vector.load %arg5[%c0_29, %c0_30, %c0_31] : memref<1x4x3xf32, #tpu.memory_space<vmem>>, vector<1x4x3xf32>
      %55 = vector.shape_cast %54 : vector<1x4x3xf32> to vector<4x3xf32>
      %56 = vector.shape_cast %53 : vector<4x3xf32> to vector<1x4x3xf32>
      tpu.vector_store %arg5[%c0_29, %c0_30, %c0_31], %56 {strides = array<i32>} : memref<1x4x3xf32, #tpu.memory_space<vmem>>, vector<1x4x3xf32>,
    } else {
    }
    %c0_12 = arith.constant 0 : index
    %c0_13 = arith.constant 0 : index
    %c0_14 = arith.constant 0 : index
    %35 = vector.load %arg5[%c0_12, %c0_13, %c0_14] : memref<1x4x3xf32, #tpu.memory_space<vmem>>, vector<1x4x1xf32>
    %36 = vector.shape_cast %35 : vector<1x4x1xf32> to vector<4x1xf32>
    %37 = arith.addf %36, %24 : vector<4x1xf32>
    %c0_15 = arith.constant 0 : index
    %c0_16 = arith.constant 0 : index
    %c0_17 = arith.constant 0 : index
    %38 = vector.load %arg5[%c0_15, %c0_16, %c0_17] : memref<1x4x3xf32, #tpu.memory_space<vmem>>, vector<1x4x1xf32>
    %39 = vector.shape_cast %38 : vector<1x4x1xf32> to vector<4x1xf32>
    %40 = vector.shape_cast %37 : vector<4x1xf32> to vector<1x4x1xf32>
    tpu.vector_store %arg5[%c0_15, %c0_16, %c0_17], %40 {strides = array<i32>} : memref<1x4x3xf32, #tpu.memory_space<vmem>>, vector<1x4x1xf32>,
    %c0_18 = arith.constant 0 : index
    %c0_19 = arith.constant 0 : index
    %c1 = arith.constant 1 : index
    %41 = vector.load %arg5[%c0_18, %c0_19, %c1] : memref<1x4x3xf32, #tpu.memory_space<vmem>>, vector<1x4x1xf32>
    %42 = vector.shape_cast %41 : vector<1x4x1xf32> to vector<4x1xf32>
    %43 = arith.addf %42, %27 : vector<4x1xf32>
    %c0_20 = arith.constant 0 : index
    %c0_21 = arith.constant 0 : index
    %c1_22 = arith.constant 1 : index
    %44 = vector.load %arg5[%c0_20, %c0_21, %c1_22] : memref<1x4x3xf32, #tpu.memory_space<vmem>>, vector<1x4x1xf32>
    %45 = vector.shape_cast %44 : vector<1x4x1xf32> to vector<4x1xf32>
    %46 = vector.shape_cast %43 : vector<4x1xf32> to vector<1x4x1xf32>
    tpu.vector_store %arg5[%c0_20, %c0_21, %c1_22], %46 {strides = array<i32>} : memref<1x4x3xf32, #tpu.memory_space<vmem>>, vector<1x4x1xf32>,
    %c0_23 = arith.constant 0 : index
    %c0_24 = arith.constant 0 : index
    %c2 = arith.constant 2 : index
    %47 = vector.load %arg5[%c0_23, %c0_24, %c2] : memref<1x4x3xf32, #tpu.memory_space<vmem>>, vector<1x4x1xf32>
    %48 = vector.shape_cast %47 : vector<1x4x1xf32> to vector<4x1xf32>
    %49 = arith.addf %48, %29 : vector<4x1xf32>
    %c0_25 = arith.constant 0 : index
    %c0_26 = arith.constant 0 : index
    %c2_27 = arith.constant 2 : index
    %50 = vector.load %arg5[%c0_25, %c0_26, %c2_27] : memref<1x4x3xf32, #tpu.memory_space<vmem>>, vector<1x4x1xf32>
    %51 = vector.shape_cast %50 : vector<1x4x1xf32> to vector<4x1xf32>
    %52 = vector.shape_cast %49 : vector<4x1xf32> to vector<1x4x1xf32>
    tpu.vector_store %arg5[%c0_25, %c0_26, %c2_27], %52 {strides = array<i32>} : memref<1x4x3xf32, #tpu.memory_space<vmem>>, vector<1x4x1xf32>,
    return
  }
  func.func @transform_0(%arg0: i32, %arg1: i32, %arg2: i32) -> (i32, i32, i32) {
    %c1_i32 = arith.constant 1 : i32
    %0 = arith.muli %arg0, %c1_i32 : i32
    %1 = arith.addi %0, %arg2 : i32
    %c0_i32 = arith.constant 0 : i32
    %c0_i32_0 = arith.constant 0 : i32
    return %arg1, %c0_i32, %1 : i32, i32, i32
  }
  func.func @transform_1(%arg0: i32, %arg1: i32, %arg2: i32) -> (i32, i32, i32) {
    %c1_i32 = arith.constant 1 : i32
    %0 = arith.muli %arg0, %c1_i32 : i32
    %1 = arith.addi %0, %arg2 : i32
    %c0_i32 = arith.constant 0 : i32
    %c0_i32_0 = arith.constant 0 : i32
    return %arg1, %c0_i32, %1 : i32, i32, i32
  }
  func.func @transform_2(%arg0: i32, %arg1: i32, %arg2: i32) -> (i32, i32, i32) {
    %c0_i32 = arith.constant 0 : i32
    %c0_i32_0 = arith.constant 0 : i32
    %c0_i32_1 = arith.constant 0 : i32
    return %arg0, %c0_i32, %c0_i32_0 : i32, i32, i32
  }
}

</mosaic_0001>

<bundles_post_ra>
// kernel: tpu_custom_call.1
= control target key start
LH: loop header
LB: loop body
LE: loop exit
PB: predicated region body
PF: predicated region fallthrough
CT: control target
= control target key end

     0   :  { %7 = vsyncpa [#allocation3], 0  ;;  %s870_s0 = inlined_call_operand.hbm [shape: f32[2,4,256], index: 0, kind: input, shape index: {}]   ;;  %s871_s1 = inlined_call_operand.hbm [shape: s32[2,1,256], index: 1, kind: input, shape index: {}]   ;;  %s872_s2 = inlined_call_operand.vmem [shape: f32[1,4,3], index: 2, kind: output, shape index: {}]  }
   0x1   :  { %9 = vsyncpa [#allocation3 + $0x1], 0 }
   0x2   :  { %10 = vsyncpa [#allocation5], 0 }
   0x3   :  { %12 = vsyncpa [#allocation5 + $0x1], 0  ;;  %s677_s9 = smov 0   ;;  %s679_s10 = smov 0  }
   0x4   :  { %s681_s11 = smov 0   ;;  %s683_s12 = smov 0  }
   0x5   :  { %s685_s13 = smov 0   ;;  %s687_s14 = smov 0  }
   0x6 LB: > { %s454_s15 = sadd.s32 4294967295, %s656_s14   ;;  %s33_s16 = sadd.s32 1, %s652_s13  ;;  %s656_s14 = sphi %s687_s14, %s18_s14   ;;  %s652_s13 = sphi %s685_s13, %s886_s13   ;;  %s648_s12 = sphi %s683_s12, %s885_s12   ;;  %s644_s11 = sphi %s681_s11, %s884_s11   ;;  %s640_s10 = sphi %s679_s10, %s883_s10   ;;  %s636_s9 = sphi %s677_s9, %s882_s9  }
   0x7   : > { %p35_p0 = scmp.ge.s32.totalorder %s33_s16, 2  ;;  %s48_s17 = sadd.s32 1, %s644_s11 }
   0x8   : > { %p55_p1 = scmp.ne.s32.totalorder %s644_s11, %s640_s10  ;;  %p56_p2 = scmp.eq.s32.totalorder %s656_s14, 0 }
   0x9   : > { %s888_s16 = smov (%p35_p0, %s33_s16), 0  ;;  %p61_p4 = scmp.ne.s32.totalorder %s640_s10, %s636_s9 }
   0xa   : > { %p713_p3 = por %p56_p2, %p55_p1  ;;  %s43_s19 = ssub.s32 %s652_s13, %s888_s16 }
   0xb   : > { %p62_p5 = scmp.eq.s32.totalorder %s454_s15, 0  ;;  %p46_p6 = scmp.eq.s32.totalorder %s43_s19, 0 }
   0xc   : > { %p486_p8 = scmp.lt.s32.totalorder %s656_s14, 2  ;;  %s729_s22 = sand.u32 1, %s644_s11  }
   0xd   : > { %p720_p7 = por %p62_p5, %p61_p4  ;;  %s472_s23 = sshll.u32 %s652_s13, 7 }
   0xe   : > { %s726_s21 = scalar_select %p46_p6, %s644_s11, %s48_s17  }
   0xf   : > { %s875_s20 = scalar_select %p720_p7, 1, 0 }
  0x10   : > { %s457_s24 = sshll.u32 %s729_s22, 3  ;;  %s736_s27 = scalar_lea.hbm %s870_s0, %s472_s23 }
  0x11   : > { %s145_s28 = scalar_lea.vmem [#allocation2], %s457_s24  ;;  %p740_p9 = pnand %p486_p8, %p713_p3 }
  0x12   : > { %s156_s29 = sshll.u32 %s145_s28, 4  ;;  %s142_s3 = scalar_lea.sflag [#allocation3], %s729_s22  ;;  %s744_s29 = int_to_ptr.vmem [resolvable:$true] %s156_s29 }
  0x13   : > { %s542_s4 = scalar_lea.hbm %s736_s27, 128  ;;  %p544_p13 = pneg %p740_p9 }
  0x14   : > { %p543_p12 = scmp.ne.s32.totalorder %s736_s27, %s542_s4  ;;  %s547_s7 = scalar_lea.hbm %s870_s0, 256 }
  0x15   : > { %p548_p2 = scmp.lt.u32.totalorder %s736_s27, %s870_s0  ;;  %p549_p3 = scmp.lt.u32.totalorder %s547_s7, %s542_s4 }
  0x16   : > { %p545_p0 = pnand %p544_p13, %p543_p12  ;;  %p551_p5 = scmp.lt.u32.totalorder %s542_s4, %s736_s27 }
  0x17   : > { %p550_p4 = por %p549_p3, %p548_p2 }
  0x18   : > { %p546_p1 = pneg %p545_p0 }
  0x19   : > { %p552_p6 = por %p551_p5, %p550_p4 }
  0x1b   : > { %p553_p8 = pnand %p552_p6, %p546_p1 }
  0x1d   : > { %556 = shalt.err (!%p553_p8)
}
  0x1e   : > { %s557_s15 = scalar_lea.vmem %s744_s29, 128  ;;  %s658_s17 = smov [#allocation2]  }
  0x1f   : > { %p558_p12 = scmp.ne.s32.totalorder %s744_s29, %s557_s15  ;;  %s562_s18 = sshll.u32 %s658_s17, 4  ;;  %s563_s18 = int_to_ptr.vmem [resolvable:$false] %s562_s18 }
  0x20   : > { %s564_s19 = scalar_lea.vmem %s563_s18, 256  ;;  %p565_p11 = scmp.lt.s32.totalorder %s744_s29, %s563_s18 }
  0x21   : > { %p560_p0 = pnand %p558_p12, %p544_p13  ;;  %p566_p2 = scmp.lt.s32.totalorder %s564_s19, %s557_s15 }
  0x23   : > { %p561_p10 = pneg %p560_p0  ;;  %p567_p3 = por %p566_p2, %p565_p11 }
  0x25   : > { %p568_p4 = pnand %p567_p3, %p561_p10 }
  0x27   : > { %571 = shalt.err (!%p568_p4)
}
  0x28   : > { %482 = dma.hbm_to_vmem [thread:$0]  (!%p740_p9), %s736_s27, 128, %s744_s29, %s142_s3  }
  0x29   : > { %p877_p1 = scmp.lt.s32.totalorder %s656_s14, 3  ;;  %p878_p5 = scmp.ge.s32.totalorder %s656_s14, 1 }
  0x2a   : > { %s460_s24 = sshll.u32 %s729_s22, 1  ;;  %s473_s25 = sshll.u32 %s652_s13, 5 }
  0x2b   : > { %p778_p6 = pnand %p878_p5, %p877_p1  ;;  %s787_s4 = scalar_lea.hbm %s871_s1, %s473_s25 }
  0x2c   : > { %s167_s5 = scalar_lea.vmem [#allocation4], %s460_s24  ;;  %s164_s27 = scalar_lea.sflag [#allocation5], %s729_s22 }
  0x2d   : > { %s879_s23 = scalar_select %p778_p6, 1, 0 }
  0x2e   : > { %s178_s6 = sshll.u32 %s167_s5, 4  ;;  %s572_s29 = scalar_lea.hbm %s787_s4, 32  ;;  %s179_s6 = int_to_ptr.vmem [resolvable:$true] %s178_s6 }
  0x2f   : > { %p573_p10 = scmp.ne.s32.totalorder %s787_s4, %s572_s29  ;;  %s577_s8 = scalar_lea.hbm %s871_s1, 64 }
  0x30   : > { %p578_p12 = scmp.lt.u32.totalorder %s787_s4, %s871_s1  ;;  %p579_p0 = scmp.lt.u32.totalorder %s577_s8, %s572_s29 }
  0x31   : > { %p575_p11 = pnand %p573_p10, %p544_p13  ;;  %p581_p3 = scmp.lt.u32.totalorder %s572_s29, %s787_s4 }
  0x32   : > { %p580_p2 = por %p579_p0, %p578_p12 }
  0x33   : > { %p576_p8 = pneg %p575_p11 }
  0x34   : > { %p582_p4 = por %p581_p3, %p580_p2 }
  0x36   : > { %p583_p1 = pnand %p582_p4, %p576_p8 }
  0x38   : > { %586 = shalt.err (!%p583_p1)
}
  0x39   : > { %s587_s22 = scalar_lea.vmem %s179_s6, 32  ;;  %s659_s17 = smov [#allocation4]  }
  0x3a   : > { %p588_p5 = scmp.ne.s32.totalorder %s179_s6, %s587_s22  ;;  %s592_s18 = sshll.u32 %s659_s17, 4  ;;  %s593_s18 = int_to_ptr.vmem [resolvable:$false] %s592_s18 }
  0x3b   : > { %s594_s19 = scalar_lea.vmem %s593_s18, 64  ;;  %p595_p7 = scmp.lt.s32.totalorder %s179_s6, %s593_s18 }
  0x3c   : > { %p590_p10 = pnand %p588_p5, %p544_p13  ;;  %p596_p6 = scmp.lt.s32.totalorder %s594_s19, %s587_s22 }
  0x3e   : > { %p591_p11 = pneg %p590_p10  ;;  %p597_p0 = por %p596_p6, %p595_p7 }
  0x40   : > { %p598_p12 = pnand %p597_p0, %p591_p11 }
  0x42   : > { %601 = shalt.err (!%p598_p12)
}
  0x43   : > { %485 = dma.hbm_to_vmem [thread:$0]  (!%p740_p9), %s787_s4, 32, %s179_s6, %s164_s27  }
  0x44   : > { %p880_p8 = scmp.ne.s32.totalorder %s879_s23, 0 }
  0x45   : > { %s189_s24 = sand.u32 (!%p880_p8), 1, %s640_s10   ;;  %p881_p13 = scmp.ne.s32.totalorder (!%p880_p8), %s875_s20, 0 }
  0x46   : > { %187 = sbr.rel (%p880_p8) target bundleno = 321 (0x141), region = 28  ;;  %s464_s25 = sshll.u32 (!%p880_p8), %s189_s24, 3 }
  0x47   : > { %s190_s26 = scalar_lea.sflag (!%p880_p8), [#allocation3], %s189_s24  ;;  %s193_s28 = scalar_lea.vmem (!%p880_p8), [#allocation2], %s464_s25 }
  0x4d   : > { %627 = dma.done.wait (%p881_p13), %s190_s26, 128  }
  0x4e   : > { %629 = vsyncadd (%p881_p13), %s190_s26, 4294967168  ;;  %s465_s5 = sshll.u32 %s189_s24, 1  ;;  %s199_s29 = scalar_lea.sflag [#allocation5], %s189_s24 }
  0x4f   : > { %s202_s30 = scalar_lea.vmem [#allocation4], %s465_s5 }
  0x50   : > { %631 = dma.done.wait (%p881_p13), %s199_s29, 32  }
  0x51   : > { %633 = vsyncadd (%p881_p13), %s199_s29, 4294967264  ;;  %v287_v0 = vlaneseq  ;;  %vm240_vm0 = vcmask 1043456   ;;  %v235_v4 = vld [vmem:[%s193_s28] sm:$0xff]  ;;  %v236_v5 = vld [vmem:[%s202_s30] sm:$0x3]  ;;  %v660_v17 = vmov 0.0  }
  0x52   : > { %v238_v6 = vcombine.high %v235_v4, %v235_v4  ;;  %v241_v7 = vsel %vm240_vm0, %v235_v4, -inf  ;;  %vm285_vm1 = vcmp.eq.s32.totalorder %v236_v5, 255  ;;  %p330_p7 = scmp.eq.s32.totalorder %s648_s12, 0 }
  0x53   : > { %v288_v1 = vshrl.u32 %v287_v0, 7  ;;  %v242_v8 = vrot.slane %v241_v7, 4  ;;  %v286_v9 = vsel %vm285_vm1, 0, %v236_v5  ;;  %vm336_vm4 = vcmask (%p330_p7), 19456  }
  0x54   : > { %v248_v10 = vsel %vm240_vm0, %v238_v6, -inf }
  0x55   : > { %v291_v2 = vsub.s32 0, %v288_v1  ;;  %v295_v3 = vsub.s32 1, %v288_v1  ;;  %v243_v13 = vmax.f32 %v241_v7, %v242_v8  ;;  %v249_v14 = vrot.slane %v248_v10, 4 }
  0x57   : > { %v292_v11 = vrot.slane %v286_v9, %v291_v2  ;;  %v296_v12 = vrot.slane %v286_v9, %v295_v3  ;;  %v244_v15 = vrot.slane %v243_v13, 2  ;;  %v250_v16 = vmax.f32 %v248_v10, %v249_v14 }
  0x58   : > { %v661_v2 = vmov (%p330_p7), 0.0  }
  0x59   : > { %vm297_vm2 = vcmp.eq.s32.totalorder %v288_v1, %v292_v11  ;;  %vm298_vm3 = vcmp.eq.s32.totalorder %v288_v1, %v296_v12  ;;  %v245_v22 = vmax.f32 %v243_v13, %v244_v15  ;;  %v251_v23 = vrot.slane %v250_v16, 2  ;;  %337 = vst.msk [vmem:[%s872_s2] sm:$0xf] (%p330_p7), %vm336_vm4, %v661_v2 }
  0x5a   : > { %v466_v18 = vsel %vm297_vm2, 1.0, %v660_v17  ;;  %v467_v19 = vsel %vm298_vm3, 1.0, %v660_v17 }
  0x5b   : > { %v325_v20 = vsel %vm240_vm0, %v466_v18, 0.0  ;;  %v326_v21 = vsel %vm240_vm0, %v467_v19, 0.0  ;;  %v246_v25 = vrot.slane %v245_v22, 1  ;;  %v252_v26 = vmax.f32 %v250_v16, %v251_v23 }
  0x5c   : > { %v327_v24 = vadd.f32 %v326_v21, %v325_v20  ;;  %v305_v50 = vcombine.low %v466_v18, %v467_v19 }
  0x5d   : > { %v247_v27 = vmax.f32 %v245_v22, %v246_v25  ;;  %v253_v28 = vrot.slane %v252_v26, 1 }
  0x5e   : > { %328 = vadd.xlane.f32.xlu1 %v327_v24 }
  0x5f   : > { %v254_v29 = vmax.f32 %v252_v26, %v253_v28 }
  0x61   : > { %v257_v30 = vcombine.low %v247_v27, %v254_v29 }
  0x63   : > { %v259_v31 = vsub.f32 %v235_v4, %v257_v30 }
  0x65   : > { %v260_v32 = vmul.f32 1.442695, %v259_v31 }
  0x67   : > { %538 = vpow2.f32 %v260_v32 }
  0x71   : > { %v539_v33 = vpop.eup %538 }
  0x72   : > { %v263_v34 = vcombine.high %v539_v33, %v539_v33  ;;  %v265_v35 = vsel %vm240_vm0, %v539_v33, 0.0 }
  0x73   : > { %v266_v36 = vrot.slane %v265_v35, 4 }
  0x74   : > { %v272_v37 = vsel %vm240_vm0, %v263_v34, 0.0 }
  0x75   : > { %v267_v38 = vadd.f32 %v266_v36, %v265_v35  ;;  %v273_v39 = vrot.slane %v272_v37, 4 }
  0x77   : > { %v268_v40 = vrot.slane %v267_v38, 2  ;;  %v274_v41 = vadd.f32 %v273_v39, %v272_v37 }
  0x79   : > { %v269_v42 = vadd.f32 %v268_v40, %v267_v38  ;;  %v275_v43 = vrot.slane %v274_v41, 2 }
  0x7b   : > { %v270_v44 = vrot.slane %v269_v42, 1  ;;  %v276_v45 = vadd.f32 %v275_v43, %v274_v41 }
  0x7d   : > { %v271_v46 = vadd.f32 %v270_v44, %v269_v42  ;;  %v277_v47 = vrot.slane %v276_v45, 1 }
  0x7f   : > { %v278_v48 = vadd.f32 %v277_v47, %v276_v45 }
  0x81   : > { %v281_v49 = vcombine.low %v271_v46, %v278_v48 }
  0x83   : > { %540 = vrcp.f32 %v281_v49 }
  0x8d   : > { %v541_v51 = vpop.eup %540 }
  0x8e   : > { %v284_v52 = vmul.f32 %v541_v51, %v539_v33 }
  0x90   : > { %v307_v53 = vmul.f32 %v305_v50, %v284_v52  ;;  %v316_v54 = vmul.f32 %v284_v52, %v284_v52 }
  0x92   : > { %v309_v55 = vcombine.high %v307_v53, %v307_v53  ;;  %v311_v56 = vsel %vm240_vm0, %v307_v53, 0.0  ;;  %v318_v57 = vcombine.high %v316_v54, %v316_v54  ;;  %v320_v59 = vsel %vm240_vm0, %v316_v54, 0.0 }
  0x94   : > { %v312_v58 = vsel %vm240_vm0, %v309_v55, 0.0  ;;  %v321_v60 = vsel %vm240_vm0, %v318_v57, 0.0 }
  0x95   : > { %v313_v61 = vadd.f32 %v312_v58, %v311_v56  ;;  %v322_v62 = vadd.f32 %v321_v60, %v320_v59 }
  0x97   : > { %314 = vadd.xlane.f32.xlu0 %v313_v61 }
  0x9b   : > { %323 = vadd.xlane.f32.xlu0 %v322_v62 }
  0xeb   : > { %v329_v63 = vpop.xlane.xlu1 %328 }
 0x122   : > { %335 = sbr.rel (!%p330_p7) target bundleno = 297 (0x129), region = 40 }
 0x124   : > { %v315_v0 = vpop.xlane.xlu0 %314 }
 0x128   : > { %v324_v1 = vpop.xlane.xlu0 %323 }
 0x129 PF: > { %v338_v3 = vld [vmem:[%s872_s2] sm:$0xf]  ;;  %vm340_vm5 = vcmask 3072   ;;  %vm344_vm6 = vcmask 11272   ;;  %vm348_vm7 = vcmask 19472  }
 0x12a   : > { %v339_v4 = vadd.f32 %v338_v3, %v315_v0 }
 0x12c   : > { %341 = vst.msk [vmem:[%s872_s2] sm:$0xf] %vm340_vm5, %v339_v4 }
 0x133   : > { %v342_v5 = vld [vmem:[%s872_s2] sm:$0xf] }
 0x134   : > { %v343_v6 = vadd.f32 %v342_v5, %v324_v1 }
 0x136   : > { %345 = vst.msk [vmem:[%s872_s2] sm:$0xf] %vm344_vm6, %v343_v6 }
 0x13d   : > { %v346_v7 = vld [vmem:[%s872_s2] sm:$0xf] }
 0x13e   : > { %v347_v8 = vadd.f32 %v346_v7, %v329_v63 }
 0x140   : > { %349 = vst.msk [vmem:[%s872_s2] sm:$0xf] %vm348_vm7, %v347_v8 }
 0x141 PF: > { %s18_s14 = sadd.s32 1, %s656_s14   ;;  %s882_s9 = smov %s640_s10 }
 0x142   : > { %p15_p9 = scmp.ge.s32.totalorder %s18_s14, 4   ;;  %s883_s10 = smov %s644_s11 }
 0x143   : > { %s884_s11 = smov %s726_s21  ;;  %s885_s12 = smov %s652_s13 }
 0x144   : > { %s886_s13 = smov %s888_s16  ;;  %17 = sbr.rel (!%p15_p9) target bundleno = 6 (0x6), region = 85 }
 0x14b   :  { %369 = vsyncpa [#allocation3], 1 }
 0x14c   :  { %371 = vsyncpa [#allocation3 + $0x1], 1 }
 0x14d   :  { %372 = vsyncpa [#allocation5], 1 }
 0x14e   :  { %374 = vsyncpa [#allocation5 + $0x1], 1 }

</bundles_post_ra>
